<compile_context>
chip_gen: v7x
topology: tpu7x:2x2x1
jax: 0.10.0
libtpu: 0.0.40
codegen_flags: <defaults>
</compile_context>

<pallas_src>
import jax
import jax.numpy as jnp
from jax.experimental import pallas as pl
from jax.experimental.pallas import tpu as pltpu

NEG_INF = -1e30           # finite "-inf": keeps fully padded rows NaN-free
_VMEM_BUDGET = 40 << 20   # target double-buffered working set for tile sizing
_VMEM_LIMIT = 48 << 20    # scoped-VMEM limit for Mosaic (< 64 MiB v7x VMEM/TC)


def onto_attn_kernel(leaves_ref, anc_ref, cnt_ref,
                     w1_ref, b1_ref, w2_ref, b2_ref, out_ref):
    """One leaf-row tile of the GRAM ontology attention.

    leaves_ref, anc_ref : (A, T, E) bf16  ancestor-major gathered embeddings
    cnt_ref             : (T, 1)    int32 valid-ancestor count (0 => pad/zero row)
    w1_ref              : (2E, D)   bf16  attn weight (rows [0,E)=leaves, [E,2E)=ancestors)
    b1_ref              : (1, D)    f32   attn bias
    w2_ref              : (1, D)    f32   attnCombine weight stored as a row
    b2_ref              : (1, 1)    f32   attnCombine bias (SMEM scalar)
    out_ref             : (T, E)    f32
    """
    A, T, E = leaves_ref.shape

    # ---- attention MLP on the MXU (bf16 operands, f32 accumulation) ---------
    # (A, T, E) -> (A*T, E) collapses leading dims only: layout preserving since
    # T % 16 == 0 (bf16 sublane packing) and the lane dim E is untouched.
    l2 = leaves_ref[...].reshape(A * T, E)
    a2 = anc_ref[...].reshape(A * T, E)
    if E % 128 == 0:
        # Lane-tile aligned: fuse into a single K=2E matmul (half the MXU pushes).
        x = jnp.concatenate([l2, a2], axis=-1)
        acc = jnp.dot(x, w1_ref[...], preferred_element_type=jnp.float32)
    else:
        acc = (jnp.dot(l2, w1_ref[:E, :], preferred_element_type=jnp.float32) +
               jnp.dot(a2, w1_ref[E:, :], preferred_element_type=jnp.float32))
    h = jnp.tanh(acc + b1_ref[...])                              # (A*T, D) f32

    # ---- combine layer (D -> 1): VPU multiply + lane reduce ------------------
    pre = jnp.sum(h * w2_ref[...], axis=-1, keepdims=True) + b2_ref[0, 0]  # (A*T, 1)

    # ---- masked softmax over the ancestor axis -------------------------------
    # Slot i of a row is valid iff i < count.  The mask is a finite additive
    # -1e30 so fully padded rows (count == 0) stay NaN-free; they are zeroed at
    # the end.  Only running (T,1) slabs stay live; exp(slot - m) is recomputed
    # per use (cheap EUP work) instead of keeping A slabs alive.
    cnt = cnt_ref[...]                                           # (T, 1) int32

    def slot_logit(i):
        s = pre[i * T:(i + 1) * T]            # (T, 1) sublane-aligned static slice
        return s + jnp.where(i < cnt, 0.0, NEG_INF)

    m = slot_logit(0)
    for i in range(1, A):                                        # A small & static
        m = jnp.maximum(m, slot_logit(i))
    denom = jnp.exp(slot_logit(0) - m)
    for i in range(1, A):
        denom = denom + jnp.exp(slot_logit(i) - m)
    inv = pl.reciprocal(denom, approx=True)                      # (T, 1)

    # ---- weighted sum of ancestor embeddings ---------------------------------
    out = anc_ref[0].astype(jnp.float32) * (jnp.exp(slot_logit(0) - m) * inv)
    for i in range(1, A):
        w = jnp.exp(slot_logit(i) - m) * inv
        out = out + anc_ref[i].astype(jnp.float32) * w
    out = out * (cnt > 0).astype(jnp.float32)                    # zero pad rows
    out_ref[...] = out.astype(out_ref.dtype)


def _round_up(x, m):
    return ((x + m - 1) // m) * m


def _tile_vmem_bytes(a_max, tile_n, emb_dim, attn_dim):
    """Double-buffered VMEM footprint (bytes) of one grid step."""
    lanes = lambda n: _round_up(max(n, 1), 128)
    stream = a_max * tile_n * lanes(emb_dim) * 2                 # one bf16 emb stream
    cnt = tile_n * lanes(1) * 4                                  # int32 count column
    outb = tile_n * lanes(emb_dim) * 4                           # f32 output tile
    wts = (_round_up(2 * emb_dim, 16) * lanes(attn_dim) * 2      # bf16 w1
           + 2 * 8 * lanes(attn_dim) * 4)                        # f32 b1 + w2 rows
    return 2 * (2 * stream + cnt + outb + wts)                   # x2: double buffer


def _pick_tile(total_rows, a_max, emb_dim, attn_dim, tile_n, budget=_VMEM_BUDGET):
    """Largest tile_n (multiple of 16, <= requested) whose working set fits."""
    tile_n = max(16, (min(tile_n, _round_up(total_rows, 16)) // 16) * 16)
    while tile_n > 16 and _tile_vmem_bytes(a_max, tile_n, emb_dim, attn_dim) > budget:
        tile_n -= 16
    return tile_n


def _onto_emb_bucket(emb_bf16, w1_bf16, b1_row, w2_row, b2_scalar,
                     leaves_list, ancestors_list, tile_n):
    """One pallas_call over a bucket of ontology groups sharing a padded A_max."""
    _, E = emb_bf16.shape
    D = w1_bf16.shape[1]
    a_max = max(int(l.shape[1]) for l in leaves_list)
    total = sum(int(l.shape[0]) for l in leaves_list)

    tile_n = _pick_tile(total, a_max, E, D, tile_n)
    padded = pl.cdiv(total, tile_n) * tile_n

    # Per-row indices (padded ancestor slots -> table row 0) and valid counts.
    l_parts, a_parts, c_parts = [], [], []
    for lv, an in zip(leaves_list, ancestors_list):
        n, a = lv.shape
        l_parts.append(jnp.pad(lv.astype(jnp.int32), ((0, 0), (0, a_max - a))))
        a_parts.append(jnp.pad(an.astype(jnp.int32), ((0, 0), (0, a_max - a))))
        c_parts.append(jnp.full((n, 1), a, jnp.int32))
    n_pad = padded - total
    if n_pad:
        l_parts.append(jnp.zeros((n_pad, a_max), jnp.int32))
        a_parts.append(jnp.zeros((n_pad, a_max), jnp.int32))
        c_parts.append(jnp.zeros((n_pad, 1), jnp.int32))
    leaves_idx = jnp.concatenate(l_parts, axis=0)                # (padded, a_max)
    anc_idx = jnp.concatenate(a_parts, axis=0)
    count = jnp.concatenate(c_parts, axis=0)                     # (padded, 1)

    # Embedding gather, ancestor-major (a_max, padded, E), streamed as bf16.
    # TODO(synk): move this gather in-kernel against a VMEM-resident table once
    # Mosaic exposes a robust dynamic row-gather (jnp.take on a VMEM ref).
    leaves_emb = jnp.take(emb_bf16, leaves_idx.T, axis=0)
    anc_emb = jnp.take(emb_bf16, anc_idx.T, axis=0)

    resident = lambda shape: pl.BlockSpec(shape, lambda i: (0, 0))
    out = pl.pallas_call(
        onto_attn_kernel,
        out_shape=jax.ShapeDtypeStruct((padded, E), jnp.float32),
        grid=(padded // tile_n,),
        in_specs=[
            pl.BlockSpec((a_max, tile_n, E), lambda i: (0, i, 0)),  # leaves  (bf16)
            pl.BlockSpec((a_max, tile_n, E), lambda i: (0, i, 0)),  # ancestors (bf16)
            pl.BlockSpec((tile_n, 1), lambda i: (i, 0)),            # valid count
            resident((2 * E, D)),                                   # w1 (bf16, resident)
            resident((1, D)),                                       # b1
            resident((1, D)),                                       # w2 row
            pl.BlockSpec(memory_space=pltpu.MemorySpace.SMEM),      # b2 scalar
        ],
        out_specs=pl.BlockSpec((tile_n, E), lambda i: (i, 0)),
        compiler_params=pltpu.CompilerParams(
            dimension_semantics=("parallel",),
            vmem_limit_bytes=_VMEM_LIMIT),
    )(leaves_emb, anc_emb, count, w1_bf16, b1_row, w2_row, b2_scalar)
    return out[:total]


def onto_emb_forward(emb_table, w1, b1, w2, b2, leaves_list, ancestors_list,
                     tile_n=512, max_buckets=3):
    """JAX/Pallas equivalent of OntoEmb.forward((leavesList, ancestorsList)).

    VMEM math per grid step (double buffered):
        2 bf16 emb streams : 2 * 2 * A_max * tile_n * roundup(E,128) * 2 B
        int32 count column : 2 * tile_n * 128 * 4 B
        f32 output tile    : 2 * tile_n * roundup(E,128) * 4 B
    At A_max=12, tile_n=512, E<=128 this is ~14 MiB, so tile_n=512 is kept on
    all of v5e/v6e/v7x; what actually needed raising was the compiler's scoped
    VMEM default (16/32 MiB), done via vmem_limit_bytes above.
    """
    E = emb_table.shape[1]
    ngroups = len(leaves_list)
    n_list = [int(l.shape[0]) for l in leaves_list]
    a_list = [int(l.shape[1]) for l in leaves_list]

    emb_bf16 = emb_table.astype(jnp.bfloat16)
    w1_bf16 = w1.astype(jnp.bfloat16)
    b1_row = b1.reshape(1, -1).astype(jnp.float32)
    w2_row = w2.reshape(1, -1).astype(jnp.float32)
    b2_scalar = b2.reshape(1, 1).astype(jnp.float32)

    # Bucket groups by ancestor count (contiguous chunks of the count-sorted
    # group list, ~equal leaf rows per bucket) so rows are padded only to their
    # bucket's A_max instead of the global maximum.
    order = sorted(range(ngroups), key=lambda g: a_list[g])
    nbuckets = max(1, min(max_buckets, ngroups))
    total_rows = max(1, sum(n_list))
    buckets = [[] for _ in range(nbuckets)]
    seen = 0
    for g in order:
        b = min(seen * nbuckets // total_rows, nbuckets - 1)
        buckets[b].append(g)
        seen += n_list[g]
    buckets = [b for b in buckets if b]

    group_out = [None] * ngroups
    for bgroups in buckets:
        bucket_out = _onto_emb_bucket(
            emb_bf16, w1_bf16, b1_row, w2_row, b2_scalar,
            [leaves_list[g] for g in bgroups],
            [ancestors_list[g] for g in bgroups], tile_n)
        off = 0
        for g in bgroups:
            group_out[g] = bucket_out[off:off + n_list[g]]
            off += n_list[g]
    group_out.append(jnp.zeros((1, E), jnp.float32))     # trailing all-zero row
    return jnp.concatenate(group_out, axis=0)


def onto_emb_reference(emb_table, w1, b1, w2, b2, leaves_list, ancestors_list):
    """Pure-JAX reference mirroring the PyTorch forward."""
    outs = []
    for leaves, ancestors in zip(leaves_list, ancestors_list):
        l = jnp.take(emb_table, leaves, axis=0)
        a = jnp.take(emb_table, ancestors, axis=0)
        x = jnp.concatenate([l, a], axis=2)
        h = jnp.tanh(x @ w1 + b1)
        pre = h @ w2 + b2                                 # (N, A, 1)
        attn = jax.nn.softmax(pre, axis=1)
        outs.append(jnp.sum(a * attn, axis=1))
    outs.append(jnp.zeros((1, emb_table.shape[1]), jnp.float32))
    return jnp.concatenate(outs, axis=0)


if __name__ == "__main__":
    key = jax.random.PRNGKey(0)
    dxVocabSize, dxnumAncestors, dxEmbDim, attnDim = 20, 12, 32, 16
    total_vocab = dxVocabSize + dxnumAncestors

    k = jax.random.split(key, 9)
    # Deterministic synthetic parameters (shapes match the torch module):
    #   dxEmb.weight: (vocab + ancestors, EmbDim); attn: Linear(2*EmbDim -> attnDim)
    #   attnCombine: Linear(attnDim -> 1).  Weights stored math-style (in, out).
    emb_table = jax.random.normal(k[0], (total_vocab, dxEmbDim), jnp.float32)
    w1 = jax.random.normal(k[1], (2 * dxEmbDim, attnDim), jnp.float32) * 0.1
    b1 = jax.random.normal(k[2], (attnDim,), jnp.float32) * 0.1
    w2 = jax.random.normal(k[3], (attnDim, 1), jnp.float32) * 0.1
    b2 = jax.random.normal(k[4], (1,), jnp.float32) * 0.1

    # Two ontology groups with different (#leaves, #ancestors-per-leaf); sizes
    # chosen so each ancestor-count bucket runs a multi-step grid at tile_n=16.
    leaves_list = [
        jax.random.randint(k[5], (24, 4), 0, total_vocab),
        jax.random.randint(k[6], (17, 6), 0, total_vocab),
    ]
    ancestors_list = [
        jax.random.randint(k[7], (24, 4), 0, total_vocab),
        jax.random.randint(k[8], (17, 6), 0, total_vocab),
    ]

    out = onto_emb_forward(emb_table, w1, b1, w2, b2,
                           leaves_list, ancestors_list, tile_n=16)
    out = jax.block_until_ready(out)

    ref = onto_emb_reference(emb_table, w1, b1, w2, b2,
                             leaves_list, ancestors_list)
    assert out.shape == (24 + 17 + 1, dxEmbDim), out.shape
    # bf16 embedding streams + bf16 MXU operands + approx reciprocal vs the
    # f32 reference -> loose tolerance.
    err = float(jnp.max(jnp.abs(out - ref)))
    assert jnp.allclose(out, ref, rtol=5e-2, atol=5e-2), err

    print("KERNEL_OK")
</pallas_src>

<mosaic_0001>
module attributes {stable_mosaic.version = 11 : i64} {
  func.func @onto_attn_kernel(%arg0: i32, %arg1: memref<4x16x32xbf16, #tpu.memory_space<vmem>>, %arg2: memref<4x16x32xbf16, #tpu.memory_space<vmem>>, %arg3: memref<16x1xi32, #tpu.memory_space<vmem>>, %arg4: memref<64x16xbf16, #tpu.memory_space<vmem>>, %arg5: memref<1x16xf32, #tpu.memory_space<vmem>>, %arg6: memref<1x16xf32, #tpu.memory_space<vmem>>, %arg7: memref<1x1xf32, #tpu.memory_space<smem>>, %arg8: memref<16x32xf32, #tpu.memory_space<vmem>>) attributes {dimension_semantics = [#tpu.dimension_semantics<parallel>], iteration_bounds = array<i64: 2>, scalar_prefetch = 0 : i64, scratch_operands = 0 : i64, tpu.core_type = #tpu.core_type<tc>, window_params = [{transform_indices = @transform_0, window_bounds = array<i64: 4, 16, 32>}, {transform_indices = @transform_1, window_bounds = array<i64: 4, 16, 32>}, {transform_indices = @transform_2, window_bounds = array<i64: 16, 1>}, {pipeline_mode = #tpu.pipeline_mode<synchronous>, transform_indices = @transform_3, window_bounds = array<i64: 64, 16>}, {pipeline_mode = #tpu.pipeline_mode<synchronous>, transform_indices = @transform_4, window_bounds = array<i64: 1, 16>}, {pipeline_mode = #tpu.pipeline_mode<synchronous>, transform_indices = @transform_5, window_bounds = array<i64: 1, 16>}, {transform_indices = @transform_6, window_bounds = array<i64: 1, 1>}, {transform_indices = @transform_7, window_bounds = array<i64: 16, 32>}]} {
    %c0 = arith.constant 0 : index
    %c0_0 = arith.constant 0 : index
    %c0_1 = arith.constant 0 : index
    %0 = vector.load %arg1[%c0, %c0_0, %c0_1] : memref<4x16x32xbf16, #tpu.memory_space<vmem>>, vector<4x16x32xbf16>
    %1 = vector.shape_cast %0 : vector<4x16x32xbf16> to vector<64x32xbf16>
    %c0_2 = arith.constant 0 : index
    %c0_3 = arith.constant 0 : index
    %c0_4 = arith.constant 0 : index
    %2 = vector.load %arg2[%c0_2, %c0_3, %c0_4] : memref<4x16x32xbf16, #tpu.memory_space<vmem>>, vector<4x16x32xbf16>
    %3 = vector.shape_cast %2 : vector<4x16x32xbf16> to vector<64x32xbf16>
    %c0_5 = arith.constant 0 : index
    %c0_6 = arith.constant 0 : index
    %4 = vector.load %arg4[%c0_5, %c0_6] : memref<64x16xbf16, #tpu.memory_space<vmem>>, vector<32x16xbf16>
    %cst = arith.constant dense<0.000000e+00> : vector<64x16xf32>
    %5 = tpu.matmul %1, %4, %cst {dimension_numbers = #tpu.dot_dimension_numbers<[1], [0], [0], [1], [0, 0, 1, 1], [], []>} : vector<64x32xbf16>, vector<32x16xbf16>, vector<64x16xf32> -> vector<64x16xf32>
    %c32 = arith.constant 32 : index
    %c0_7 = arith.constant 0 : index
    %6 = vector.load %arg4[%c32, %c0_7] : memref<64x16xbf16, #tpu.memory_space<vmem>>, vector<32x16xbf16>
    %cst_8 = arith.constant dense<0.000000e+00> : vector<64x16xf32>
    %7 = tpu.matmul %3, %6, %cst_8 {dimension_numbers = #tpu.dot_dimension_numbers<[1], [0], [0], [1], [0, 0, 1, 1], [], []>} : vector<64x32xbf16>, vector<32x16xbf16>, vector<64x16xf32> -> vector<64x16xf32>
    %8 = arith.addf %5, %7 : vector<64x16xf32>
    %c0_9 = arith.constant 0 : index
    %c0_10 = arith.constant 0 : index
    %9 = vector.load %arg5[%c0_9, %c0_10] : memref<1x16xf32, #tpu.memory_space<vmem>>, vector<1x16xf32>
    %10 = vector.broadcast %9 : vector<1x16xf32> to vector<64x16xf32>
    %11 = arith.addf %8, %10 : vector<64x16xf32>
    %12 = math.tanh %11 : vector<64x16xf32>
    %c0_11 = arith.constant 0 : index
    %c0_12 = arith.constant 0 : index
    %13 = vector.load %arg6[%c0_11, %c0_12] : memref<1x16xf32, #tpu.memory_space<vmem>>, vector<1x16xf32>
    %14 = vector.broadcast %13 : vector<1x16xf32> to vector<64x16xf32>
    %15 = arith.mulf %12, %14 : vector<64x16xf32>
    %cst_13 = arith.constant dense<0.000000e+00> : vector<64xf32>
    %16 = vector.multi_reduction <add>, %15, %cst_13 [1] : vector<64x16xf32> to vector<64xf32>
    %17 = vector.shape_cast %16 : vector<64xf32> to vector<64x1xf32>
    %c0_14 = arith.constant 0 : index
    %c0_15 = arith.constant 0 : index
    %18 = memref.load %arg7[%c0_14, %c0_15] : memref<1x1xf32, #tpu.memory_space<smem>>
    %19 = vector.broadcast %18 : f32 to vector<64x1xf32>
    %20 = arith.addf %17, %19 : vector<64x1xf32>
    %c0_16 = arith.constant 0 : index
    %c0_17 = arith.constant 0 : index
    %21 = vector.load %arg3[%c0_16, %c0_17] : memref<16x1xi32, #tpu.memory_space<vmem>>, vector<16x1xi32>
    %22 = vector.extract_strided_slice %20 {offsets = [0, 0], sizes = [16, 1], strides = [1, 1]} : vector<64x1xf32> to vector<16x1xf32>
    %c0_i32 = arith.constant 0 : i32
    %23 = vector.broadcast %c0_i32 : i32 to vector<16x1xi32>
    %24 = arith.cmpi sgt, %21, %23 : vector<16x1xi32>
    %cst_18 = arith.constant 0.000000e+00 : f32
    %cst_19 = arith.constant -1.000000e+30 : f32
    %25 = vector.broadcast %cst_18 : f32 to vector<16x1xf32>
    %26 = vector.broadcast %cst_19 : f32 to vector<16x1xf32>
    %27 = arith.select %24, %25, %26 : vector<16x1xi1>, vector<16x1xf32>
    %28 = arith.addf %22, %27 : vector<16x1xf32>
    %29 = vector.extract_strided_slice %20 {offsets = [16, 0], sizes = [16, 1], strides = [1, 1]} : vector<64x1xf32> to vector<16x1xf32>
    %c1_i32 = arith.constant 1 : i32
    %30 = vector.broadcast %c1_i32 : i32 to vector<16x1xi32>
    %31 = arith.cmpi sgt, %21, %30 : vector<16x1xi32>
    %cst_20 = arith.constant 0.000000e+00 : f32
    %cst_21 = arith.constant -1.000000e+30 : f32
    %32 = vector.broadcast %cst_20 : f32 to vector<16x1xf32>
    %33 = vector.broadcast %cst_21 : f32 to vector<16x1xf32>
    %34 = arith.select %31, %32, %33 : vector<16x1xi1>, vector<16x1xf32>
    %35 = arith.addf %29, %34 : vector<16x1xf32>
    %36 = arith.maximumf %28, %35 : vector<16x1xf32>
    %37 = vector.extract_strided_slice %20 {offsets = [32, 0], sizes = [16, 1], strides = [1, 1]} : vector<64x1xf32> to vector<16x1xf32>
    %c2_i32 = arith.constant 2 : i32
    %38 = vector.broadcast %c2_i32 : i32 to vector<16x1xi32>
    %39 = arith.cmpi sgt, %21, %38 : vector<16x1xi32>
    %cst_22 = arith.constant 0.000000e+00 : f32
    %cst_23 = arith.constant -1.000000e+30 : f32
    %40 = vector.broadcast %cst_22 : f32 to vector<16x1xf32>
    %41 = vector.broadcast %cst_23 : f32 to vector<16x1xf32>
    %42 = arith.select %39, %40, %41 : vector<16x1xi1>, vector<16x1xf32>
    %43 = arith.addf %37, %42 : vector<16x1xf32>
    %44 = arith.maximumf %36, %43 : vector<16x1xf32>
    %45 = vector.extract_strided_slice %20 {offsets = [48, 0], sizes = [16, 1], strides = [1, 1]} : vector<64x1xf32> to vector<16x1xf32>
    %c3_i32 = arith.constant 3 : i32
    %46 = vector.broadcast %c3_i32 : i32 to vector<16x1xi32>
    %47 = arith.cmpi sgt, %21, %46 : vector<16x1xi32>
    %cst_24 = arith.constant 0.000000e+00 : f32
    %cst_25 = arith.constant -1.000000e+30 : f32
    %48 = vector.broadcast %cst_24 : f32 to vector<16x1xf32>
    %49 = vector.broadcast %cst_25 : f32 to vector<16x1xf32>
    %50 = arith.select %47, %48, %49 : vector<16x1xi1>, vector<16x1xf32>
    %51 = arith.addf %45, %50 : vector<16x1xf32>
    %52 = arith.maximumf %44, %51 : vector<16x1xf32>
    %53 = vector.extract_strided_slice %20 {offsets = [0, 0], sizes = [16, 1], strides = [1, 1]} : vector<64x1xf32> to vector<16x1xf32>
    %c0_i32_26 = arith.constant 0 : i32
    %54 = vector.broadcast %c0_i32_26 : i32 to vector<16x1xi32>
    %55 = arith.cmpi sgt, %21, %54 : vector<16x1xi32>
    %cst_27 = arith.constant 0.000000e+00 : f32
    %cst_28 = arith.constant -1.000000e+30 : f32
    %56 = vector.broadcast %cst_27 : f32 to vector<16x1xf32>
    %57 = vector.broadcast %cst_28 : f32 to vector<16x1xf32>
    %58 = arith.select %55, %56, %57 : vector<16x1xi1>, vector<16x1xf32>
    %59 = arith.addf %53, %58 : vector<16x1xf32>
    %60 = arith.subf %59, %52 : vector<16x1xf32>
    %61 = math.exp %60 : vector<16x1xf32>
    %62 = vector.extract_strided_slice %20 {offsets = [16, 0], sizes = [16, 1], strides = [1, 1]} : vector<64x1xf32> to vector<16x1xf32>
    %c1_i32_29 = arith.constant 1 : i32
    %63 = vector.broadcast %c1_i32_29 : i32 to vector<16x1xi32>
    %64 = arith.cmpi sgt, %21, %63 : vector<16x1xi32>
    %cst_30 = arith.constant 0.000000e+00 : f32
    %cst_31 = arith.constant -1.000000e+30 : f32
    %65 = vector.broadcast %cst_30 : f32 to vector<16x1xf32>
    %66 = vector.broadcast %cst_31 : f32 to vector<16x1xf32>
    %67 = arith.select %64, %65, %66 : vector<16x1xi1>, vector<16x1xf32>
    %68 = arith.addf %62, %67 : vector<16x1xf32>
    %69 = arith.subf %68, %52 : vector<16x1xf32>
    %70 = math.exp %69 : vector<16x1xf32>
    %71 = arith.addf %61, %70 : vector<16x1xf32>
    %72 = vector.extract_strided_slice %20 {offsets = [32, 0], sizes = [16, 1], strides = [1, 1]} : vector<64x1xf32> to vector<16x1xf32>
    %c2_i32_32 = arith.constant 2 : i32
    %73 = vector.broadcast %c2_i32_32 : i32 to vector<16x1xi32>
    %74 = arith.cmpi sgt, %21, %73 : vector<16x1xi32>
    %cst_33 = arith.constant 0.000000e+00 : f32
    %cst_34 = arith.constant -1.000000e+30 : f32
    %75 = vector.broadcast %cst_33 : f32 to vector<16x1xf32>
    %76 = vector.broadcast %cst_34 : f32 to vector<16x1xf32>
    %77 = arith.select %74, %75, %76 : vector<16x1xi1>, vector<16x1xf32>
    %78 = arith.addf %72, %77 : vector<16x1xf32>
    %79 = arith.subf %78, %52 : vector<16x1xf32>
    %80 = math.exp %79 : vector<16x1xf32>
    %81 = arith.addf %71, %80 : vector<16x1xf32>
    %82 = vector.extract_strided_slice %20 {offsets = [48, 0], sizes = [16, 1], strides = [1, 1]} : vector<64x1xf32> to vector<16x1xf32>
    %c3_i32_35 = arith.constant 3 : i32
    %83 = vector.broadcast %c3_i32_35 : i32 to vector<16x1xi32>
    %84 = arith.cmpi sgt, %21, %83 : vector<16x1xi32>
    %cst_36 = arith.constant 0.000000e+00 : f32
    %cst_37 = arith.constant -1.000000e+30 : f32
    %85 = vector.broadcast %cst_36 : f32 to vector<16x1xf32>
    %86 = vector.broadcast %cst_37 : f32 to vector<16x1xf32>
    %87 = arith.select %84, %85, %86 : vector<16x1xi1>, vector<16x1xf32>
    %88 = arith.addf %82, %87 : vector<16x1xf32>
    %89 = arith.subf %88, %52 : vector<16x1xf32>
    %90 = math.exp %89 : vector<16x1xf32>
    %91 = arith.addf %81, %90 : vector<16x1xf32>
    %92 = tpu.reciprocal %91 {approx = true} : vector<16x1xf32> -> vector<16x1xf32>
    %c0_38 = arith.constant 0 : index
    %c0_39 = arith.constant 0 : index
    %c0_40 = arith.constant 0 : index
    %93 = vector.load %arg2[%c0_38, %c0_39, %c0_40] : memref<4x16x32xbf16, #tpu.memory_space<vmem>>, vector<1x16x32xbf16>
    %94 = vector.shape_cast %93 : vector<1x16x32xbf16> to vector<16x32xbf16>
    %95 = arith.extf %94 : vector<16x32xbf16> to vector<16x32xf32>
    %96 = vector.extract_strided_slice %20 {offsets = [0, 0], sizes = [16, 1], strides = [1, 1]} : vector<64x1xf32> to vector<16x1xf32>
    %c0_i32_41 = arith.constant 0 : i32
    %97 = vector.broadcast %c0_i32_41 : i32 to vector<16x1xi32>
    %98 = arith.cmpi sgt, %21, %97 : vector<16x1xi32>
    %cst_42 = arith.constant 0.000000e+00 : f32
    %cst_43 = arith.constant -1.000000e+30 : f32
    %99 = vector.broadcast %cst_42 : f32 to vector<16x1xf32>
    %100 = vector.broadcast %cst_43 : f32 to vector<16x1xf32>
    %101 = arith.select %98, %99, %100 : vector<16x1xi1>, vector<16x1xf32>
    %102 = arith.addf %96, %101 : vector<16x1xf32>
    %103 = arith.subf %102, %52 : vector<16x1xf32>
    %104 = math.exp %103 : vector<16x1xf32>
    %105 = arith.mulf %104, %92 : vector<16x1xf32>
    %106 = vector.broadcast %105 : vector<16x1xf32> to vector<16x32xf32>
    %107 = arith.mulf %95, %106 : vector<16x32xf32>
    %108 = vector.extract_strided_slice %20 {offsets = [16, 0], sizes = [16, 1], strides = [1, 1]} : vector<64x1xf32> to vector<16x1xf32>
    %c1_i32_44 = arith.constant 1 : i32
    %109 = vector.broadcast %c1_i32_44 : i32 to vector<16x1xi32>
    %110 = arith.cmpi sgt, %21, %109 : vector<16x1xi32>
    %cst_45 = arith.constant 0.000000e+00 : f32
    %cst_46 = arith.constant -1.000000e+30 : f32
    %111 = vector.broadcast %cst_45 : f32 to vector<16x1xf32>
    %112 = vector.broadcast %cst_46 : f32 to vector<16x1xf32>
    %113 = arith.select %110, %111, %112 : vector<16x1xi1>, vector<16x1xf32>
    %114 = arith.addf %108, %113 : vector<16x1xf32>
    %115 = arith.subf %114, %52 : vector<16x1xf32>
    %116 = math.exp %115 : vector<16x1xf32>
    %117 = arith.mulf %116, %92 : vector<16x1xf32>
    %c1 = arith.constant 1 : index
    %c0_47 = arith.constant 0 : index
    %c0_48 = arith.constant 0 : index
    %118 = vector.load %arg2[%c1, %c0_47, %c0_48] : memref<4x16x32xbf16, #tpu.memory_space<vmem>>, vector<1x16x32xbf16>
    %119 = vector.shape_cast %118 : vector<1x16x32xbf16> to vector<16x32xbf16>
    %120 = arith.extf %119 : vector<16x32xbf16> to vector<16x32xf32>
    %121 = vector.broadcast %117 : vector<16x1xf32> to vector<16x32xf32>
    %122 = arith.mulf %120, %121 : vector<16x32xf32>
    %123 = arith.addf %107, %122 : vector<16x32xf32>
    %124 = vector.extract_strided_slice %20 {offsets = [32, 0], sizes = [16, 1], strides = [1, 1]} : vector<64x1xf32> to vector<16x1xf32>
    %c2_i32_49 = arith.constant 2 : i32
    %125 = vector.broadcast %c2_i32_49 : i32 to vector<16x1xi32>
    %126 = arith.cmpi sgt, %21, %125 : vector<16x1xi32>
    %cst_50 = arith.constant 0.000000e+00 : f32
    %cst_51 = arith.constant -1.000000e+30 : f32
    %127 = vector.broadcast %cst_50 : f32 to vector<16x1xf32>
    %128 = vector.broadcast %cst_51 : f32 to vector<16x1xf32>
    %129 = arith.select %126, %127, %128 : vector<16x1xi1>, vector<16x1xf32>
    %130 = arith.addf %124, %129 : vector<16x1xf32>
    %131 = arith.subf %130, %52 : vector<16x1xf32>
    %132 = math.exp %131 : vector<16x1xf32>
    %133 = arith.mulf %132, %92 : vector<16x1xf32>
    %c2 = arith.constant 2 : index
    %c0_52 = arith.constant 0 : index
    %c0_53 = arith.constant 0 : index
    %134 = vector.load %arg2[%c2, %c0_52, %c0_53] : memref<4x16x32xbf16, #tpu.memory_space<vmem>>, vector<1x16x32xbf16>
    %135 = vector.shape_cast %134 : vector<1x16x32xbf16> to vector<16x32xbf16>
    %136 = arith.extf %135 : vector<16x32xbf16> to vector<16x32xf32>
    %137 = vector.broadcast %133 : vector<16x1xf32> to vector<16x32xf32>
    %138 = arith.mulf %136, %137 : vector<16x32xf32>
    %139 = arith.addf %123, %138 : vector<16x32xf32>
    %140 = vector.extract_strided_slice %20 {offsets = [48, 0], sizes = [16, 1], strides = [1, 1]} : vector<64x1xf32> to vector<16x1xf32>
    %c3_i32_54 = arith.constant 3 : i32
    %141 = vector.broadcast %c3_i32_54 : i32 to vector<16x1xi32>
    %142 = arith.cmpi sgt, %21, %141 : vector<16x1xi32>
    %cst_55 = arith.constant 0.000000e+00 : f32
    %cst_56 = arith.constant -1.000000e+30 : f32
    %143 = vector.broadcast %cst_55 : f32 to vector<16x1xf32>
    %144 = vector.broadcast %cst_56 : f32 to vector<16x1xf32>
    %145 = arith.select %142, %143, %144 : vector<16x1xi1>, vector<16x1xf32>
    %146 = arith.addf %140, %145 : vector<16x1xf32>
    %147 = arith.subf %146, %52 : vector<16x1xf32>
    %148 = math.exp %147 : vector<16x1xf32>
    %149 = arith.mulf %148, %92 : vector<16x1xf32>
    %c3 = arith.constant 3 : index
    %c0_57 = arith.constant 0 : index
    %c0_58 = arith.constant 0 : index
    %150 = vector.load %arg2[%c3, %c0_57, %c0_58] : memref<4x16x32xbf16, #tpu.memory_space<vmem>>, vector<1x16x32xbf16>
    %151 = vector.shape_cast %150 : vector<1x16x32xbf16> to vector<16x32xbf16>
    %152 = arith.extf %151 : vector<16x32xbf16> to vector<16x32xf32>
    %153 = vector.broadcast %149 : vector<16x1xf32> to vector<16x32xf32>
    %154 = arith.mulf %152, %153 : vector<16x32xf32>
    %155 = arith.addf %139, %154 : vector<16x32xf32>
    %c0_i32_59 = arith.constant 0 : i32
    %156 = vector.broadcast %c0_i32_59 : i32 to vector<16x1xi32>
    %157 = arith.cmpi sgt, %21, %156 : vector<16x1xi32>
    %158 = arith.extui %157 : vector<16x1xi1> to vector<16x1xi32>
    %159 = arith.sitofp %158 : vector<16x1xi32> to vector<16x1xf32>
    %160 = vector.broadcast %159 : vector<16x1xf32> to vector<16x32xf32>
    %161 = arith.mulf %155, %160 : vector<16x32xf32>
    %c0_60 = arith.constant 0 : index
    %c0_61 = arith.constant 0 : index
    %162 = vector.load %arg8[%c0_60, %c0_61] : memref<16x32xf32, #tpu.memory_space<vmem>>, vector<16x32xf32>
    tpu.vector_store %arg8[%c0_60, %c0_61], %161 {strides = array<i32>} : memref<16x32xf32, #tpu.memory_space<vmem>>, vector<16x32xf32>,
    return
  }
  func.func @transform_0(%arg0: i32) -> (i32, i32, i32) {
    %c0_i32 = arith.constant 0 : i32
    %c0_i32_0 = arith.constant 0 : i32
    %c0_i32_1 = arith.constant 0 : i32
    return %c0_i32, %arg0, %c0_i32_0 : i32, i32, i32
  }
  func.func @transform_1(%arg0: i32) -> (i32, i32, i32) {
    %c0_i32 = arith.constant 0 : i32
    %c0_i32_0 = arith.constant 0 : i32
    %c0_i32_1 = arith.constant 0 : i32
    return %c0_i32, %arg0, %c0_i32_0 : i32, i32, i32
  }
  func.func @transform_2(%arg0: i32) -> (i32, i32) {
    %c0_i32 = arith.constant 0 : i32
    %c0_i32_0 = arith.constant 0 : i32
    return %arg0, %c0_i32 : i32, i32
  }
  func.func @transform_3(%arg0: i32) -> (i32, i32) {
    %c0_i32 = arith.constant 0 : i32
    %c0_i32_0 = arith.constant 0 : i32
    %c0_i32_1 = arith.constant 0 : i32
    return %c0_i32, %c0_i32_0 : i32, i32
  }
  func.func @transform_4(%arg0: i32) -> (i32, i32) {
    %c0_i32 = arith.constant 0 : i32
    %c0_i32_0 = arith.constant 0 : i32
    %c0_i32_1 = arith.constant 0 : i32
    return %c0_i32, %c0_i32_0 : i32, i32
  }
  func.func @transform_5(%arg0: i32) -> (i32, i32) {
    %c0_i32 = arith.constant 0 : i32
    %c0_i32_0 = arith.constant 0 : i32
    %c0_i32_1 = arith.constant 0 : i32
    return %c0_i32, %c0_i32_0 : i32, i32
  }
  func.func @transform_6(%arg0: i32) -> (i32, i32) {
    %c0_i32 = arith.constant 0 : i32
    %c0_i32_0 = arith.constant 0 : i32
    %c0_i32_1 = arith.constant 0 : i32
    return %c0_i32, %c0_i32_0 : i32, i32
  }
  func.func @transform_7(%arg0: i32) -> (i32, i32) {
    %c0_i32 = arith.constant 0 : i32
    %c0_i32_0 = arith.constant 0 : i32
    return %arg0, %c0_i32 : i32, i32
  }
}

</mosaic_0001>

<bundles_post_ra>
// kernel: tpu_custom_call.1
= control target key start
LH: loop header
LB: loop body
LE: loop exit
PB: predicated region body
PF: predicated region fallthrough
CT: control target
= control target key end

     0   :  { %s1615_s0 = inlined_call_operand.vmem [shape: bf16[4,32,32], index: 0, kind: input, shape index: {}]   ;;  %s1616_s1 = inlined_call_operand.hbm [shape: bf16[4,32,32], index: 1, kind: input, shape index: {}]   ;;  %s1617_s2 = inlined_call_operand.vmem [shape: s32[32,1], index: 2, kind: input, shape index: {}]   ;;  %s1618_s3 = inlined_call_operand.vmem [shape: bf16[64,16], index: 3, kind: input, shape index: {}]   ;;  %s1619_s4 = inlined_call_operand.vmem [shape: f32[1,16], index: 4, kind: input, shape index: {}]   ;;  %s1620_s5 = inlined_call_operand.vmem [shape: f32[1,16], index: 5, kind: input, shape index: {}]   ;;  %s1621_s6 = inlined_call_operand.<no memory space> [shape: f32[1,1], index: 6, kind: input, shape index: {}]   ;;  %s1622_s7 = inlined_call_operand.hbm [shape: f32[32,32], index: 7, kind: output, shape index: {}]  }
   0x1   :  { %1623 = sst [smem:[#allocation13_spill]] %s1615_s0 }
   0x2   :  { %12 = sst [smem:[#allocation2]] %s1621_s6 }
   0x3   :  { %13 = vsyncpa [#allocation5], 0 }
   0x4   :  { %15 = vsyncpa [#allocation5 + $0x1], 0 }
   0x5   :  { %16 = vsyncpa [#allocation6], 0 }
   0x6   :  { %18 = vsyncpa [#allocation6 + $0x1], 0  ;;  %s1390_s26 = smov 0   ;;  %s1392_s27 = smov 0  }
   0x7   :  { %s1394_s28 = smov 0   ;;  %s1396_s29 = smov 0  }
   0x8 LB: > { %s1411_s6 = sadd.s32 4294967295, %s1333_s29   ;;  %s1035_s30 = sadd.s32 4294967294, %s1333_s29   ;;  %s1333_s29 = sphi %s1396_s29, %s1632_s29   ;;  %s1329_s28 = sphi %s1394_s28, %s1631_s28   ;;  %s1325_s27 = sphi %s1392_s27, %s1630_s27   ;;  %s1321_s26 = sphi %s1390_s26, %s1629_s26  }
   0x9   : > { %s1415_s8 = sadd.s32 1, %s1333_s29   ;;  %s31_s9 = sadd.s32 1, %s1329_s28 }
   0xa   : > { %s28_s10 = ssub.s32 %s1333_s29, %s1415_s8  ;;  %p38_p0 = scmp.ne.s32.totalorder %s1329_s28, %s1325_s27 }
   0xb   : > { %p29_p1 = scmp.eq.s32.totalorder %s28_s10, 0  ;;  %p39_p2 = scmp.eq.s32.totalorder %s1333_s29, 0 }
   0xc   : > { %p70_p3 = scmp.ne.s32.totalorder %s1325_s27, %s1321_s26  ;;  %p71_p4 = scmp.eq.s32.totalorder %s1411_s6, 0 }
   0xd   : > { %s1427_s11 = scalar_select %p29_p1, %s1329_s28, %s31_s9  }
   0xe   : > { %p1429_p5 = por %p39_p2, %p38_p0  ;;  %p1433_p6 = por %p71_p4, %p70_p3 }
   0xf   : > { %p204_p7 = scmp.eq.s32.totalorder %s1411_s6, 1  ;;  %p210_p8 = scmp.eq.s32.totalorder %s1035_s30, 1 }
  0x10   : > { %p1037_p11 = scmp.ge.s32.totalorder %s1333_s29, 2 }
  0x11   : > { %p1438_p9 = por %p204_p7, %p38_p0  ;;  %p1442_p10 = por %p210_p8, %p70_p3 }
  0x12   : > { %238 = sbr.rel (%p1037_p11) target bundleno = 50 (0x32), region = 32 }
  0x19   : > { %241 = sbr.rel (!%p1429_p5) target bundleno = 37 (0x25), region = 36  ;;  %s243_s16 = sand.u32 (%p1429_p5), 1, %s1329_s28  }
  0x1a   : > { %s1087_s17 = sshll.u32 (%p1429_p5), %s1333_s29, 3  ;;  %s1038_s18 = sshll.u32 (%p1429_p5), %s243_s16, 5 }
  0x1b   : > { %s1628_s0 = sld [smem:[#allocation13_spill]] (%p1429_p5)  ;;  %s245_s22 = scalar_lea.vmem (%p1429_p5), [#allocation3], %s1038_s18 }
  0x21   : > { %s248_s21 = scalar_lea.vmem %s1628_s0, %s1087_s17 }
  0x22   : > { %v264_v0 = vld [vmem:[%s248_s21] sm:$0xff]   ;;  %v268_v1 = vld [vmem:[%s248_s21 + $0x10] sm:$0xff]  }
  0x23   : > { %v272_v2 = vld [vmem:[%s248_s21 + $0x20] sm:$0xff]   ;;  %265 = vst [vmem:[%s245_s22] sm:$0xff] %v264_v0   ;;  %269 = vst [vmem:[%s245_s22 + $0x8] sm:$0xff] %v268_v1   ;;  %v276_v3 = vld [vmem:[%s248_s21 + $0x30] sm:$0xff]  }
  0x24   : > { %273 = vst [vmem:[%s245_s22 + $0x10] sm:$0xff] %v272_v2   ;;  %277 = vst [vmem:[%s245_s22 + $0x18] sm:$0xff] %v276_v3  }
  0x25 PF: > { %s319_s23 = sand.u32 1, %s1329_s28   ;;  %s1088_s24 = sshll.u32 %s1333_s29, 7 }
  0x26   : > { %s1041_s25 = sshll.u32 %s319_s23, 5  ;;  %s329_s10 = scalar_lea.hbm %s1616_s1, %s1088_s24 }
  0x27   : > { %s1153_s16 = scalar_select %p1429_p5, [#allocation0], [#allocation10] }
  0x28   : > { %s323_s17 = scalar_lea.vmem [#allocation4], %s1041_s25  ;;  %s1335_s20 = smov 256  }
  0x29   : > { %s342_s18 = sshll.u32 %s323_s17, 4  ;;  %s334_s19 = sld [smem:[%s1153_s16]]   ;;  %s343_s18 = int_to_ptr.vmem [resolvable:$true] %s342_s18 }
  0x2a   : > { %1154 = sst [smem:[#allocation9]] (%p1429_p5), %s1335_s20  ;;  %s1336_s21 = smov 128  }
  0x2b   : > { %1155 = sst [smem:[#allocation9 + $0x1]] (%p1429_p5), %s1336_s21  ;;  %s1337_s22 = smov 2  }
  0x2c   : > { %1156 = sst [smem:[#allocation9 + $0x2]] (%p1429_p5), %s1337_s22  ;;  %s1338_s0 = smov 64  }
  0x2d   : > { %1157 = sst [smem:[#allocation9 + $0x3]] (%p1429_p5), %s1338_s0  ;;  %s1339_s25 = smov 4  }
  0x2e   : > { %1158 = sst [smem:[#allocation9 + $0x4]] (%p1429_p5), %s1338_s0  ;;  %s320_s9 = scalar_lea.sflag [#allocation5], %s319_s23 }
  0x2f   : > { %s1044_s24 = sshll.u32 %s334_s19, 26  ;;  %1159 = sst [smem:[#allocation9 + $0x5]] (%p1429_p5), %s1339_s25 }
  0x30   : > { %s1045_s30 = sadd.s32 134217728, %s1044_s24  ;;  %s1340_s16 = smov [#allocation8]  }
  0x31   : > { %1160 = dma.general (%p1429_p5), %s329_s10, 512, %s343_s18, %s320_s9, %s1340_s16, [#allocation9], %s1045_s30, 0  }
  0x32 PF: > { %p1046_p12 = scmp.ge.s32.totalorder %s1333_s29, 1  ;;  %p372_p13 = scmp.lt.s32.totalorder %s1333_s29, 3 }
  0x34   : > { %p373_p0 = pnand %p1046_p12, %p372_p13 }
  0x35   : > { %s1480_s17 = sand.u32 (!%p373_p0), 1, %s1325_s27  }
  0x36   : > { %376 = sbr.rel (%p373_p0) target bundleno = 672 (0x2a0), region = 85  ;;  %s1047_s0 = sshll.u32 (!%p373_p0), %s1480_s17, 5 }
  0x37   : > { %s1483_s19 = scalar_lea.vmem (!%p373_p0), [#allocation3], %s1047_s0  ;;  %s386_s23 = scalar_lea.sflag (!%p373_p0), [#allocation5], %s1480_s17 }
  0x38   : > { %s1486_s20 = scalar_lea.vmem (!%p373_p0), [#allocation4], %s1047_s0 }
  0x3d   : > { %1312 = dma.done.wait (%p1433_p6), %s386_s23, 512  }
  0x3e   : > { %1314 = vsyncadd (%p1433_p6), %s386_s23, 4294966784  ;;  %v1219_v4 = vld [vmem:[%s1618_s3 + $0x10] sm:$0xff]   ;;  %v1220_v5 = vld [vmem:[%s1618_s3] sm:$0xff]   ;;  %vm495_vm0 = vcmask 261120   ;;  %vm720_vm1 = vcmask 130048   ;;  %s745_s12 = sld [smem:[#allocation2]] }
  0x3f   : > { %1121 = vmatprep.subr.bf16.mxu1 %v1219_v4  ;;  %v1221_v6 = vld [vmem:[%s1618_s3 + $0x18] sm:$0xff]   ;;  %1133 = vmatprep.subr.bf16.mxu0 %v1220_v5  ;;  %v1222_v7 = vld [vmem:[%s1618_s3 + $0x8] sm:$0xff]   ;;  %v1223_v8 = vld [vmem:[%s1486_s20] sm:$0xff]   ;;  %s1049_s22 = sshll.u32 %s1480_s17, 4  ;;  %s1344_s0 = smov [#allocation7]  }
  0x40   : > { %1122 = vmatpush3.bf16.msra.mxu1 %v1219_v4  ;;  %1134 = vmatpush3.bf16.msra.mxu0 %v1220_v5  ;;  %v1224_v9 = vld [vmem:[%s1483_s19] sm:$0xff]   ;;  %v1225_v10 = vld [vmem:[%s1486_s20 + $0x8] sm:$0xff]   ;;  %v1227_v12 = vld [vmem:[%s1486_s20 + $0x10] sm:$0xff]   ;;  %s428_s24 = scalar_lea.vmem [#allocation7], %s1049_s22 }
  0x41   : > { %1123 = vmatprep.subr.bf16.mxu1 %v1221_v6  ;;  %1135 = vmatprep.subr.bf16.mxu0 %v1222_v7  ;;  %v1226_v11 = vld [vmem:[%s1483_s19 + $0x8] sm:$0xff]   ;;  %v1228_v13 = vld [vmem:[%s1483_s19 + $0x10] sm:$0xff]   ;;  %v1229_v14 = vld [vmem:[%s1486_s20 + $0x18] sm:$0xff]   ;;  %s932_s13 = sshll.u32 %s428_s24, 4  ;;  %s1569_s13 = int_to_ptr.vmem [resolvable:$true] %s932_s13 }
  0x42   : > { %1125 = vmatprep.mubr.msk.bf16.mxu1 %vm495_vm0, %v1223_v8  ;;  %1137 = vmatprep.mubr.msk.bf16.mxu0 %vm495_vm0, %v1224_v9  ;;  %v1230_v15 = vld [vmem:[%s1483_s19 + $0x18] sm:$0xff]   ;;  %v1072_v18 = vld [vmem:[%s1619_s4] ss:$0 sm:$0xff]  ;;  %s1050_s19 = sshll.u32 %s1411_s6, 1  ;;  %s1267_s16 = scalar_lea.vmem %s1569_s13, 256 }
  0x43   : > { %v1073_v48 = vld [vmem:[%s1620_s5] ss:$0 sm:$0xff]  ;;  %p432_p1 = scmp.lt.s32.totalorder %s1050_s19, 3  ;;  %p1268_p2 = scmp.ne.s32.totalorder %s1569_s13, %s1267_s16 }
  0x44   : > { %1124 = vmatpush3.bf16.msra.mxu1 %v1221_v6  ;;  %1136 = vmatpush3.bf16.msra.mxu0 %v1222_v7 }
  0x45   : > { %s1634_s19 = smov (!%p432_p1, %s1050_s19), 3  ;;  %p1269_p3 = pnand %p1268_p2, %p1438_p9 }
  0x46   : > { %s1051_s23 = sshll.u32 %s1634_s19, 3  ;;  %s1271_s19 = sshll.u32 %s1344_s0, 4  ;;  %s1272_s19 = int_to_ptr.vmem [resolvable:$false] %s1271_s19 }
  0x47   : > { %1126 = vmatmul.mubr.msk.bf16.vlgmr.msra.gmra.mrb[0].mxu1 %vm495_vm0, %v1225_v10  ;;  %1138 = vmatmul.mubr.msk.bf16.vlgmr.msra.gmra.mrb[0].mxu0 %vm495_vm0, %v1226_v11  ;;  %v1341_v10 = vmov 0   ;;  %s435_s21 = scalar_lea.vmem %s1617_s2, %s1051_s23  ;;  %p1270_p4 = pneg %p1269_p3 }
  0x48   : > { %1129 = vmatprep.mubr.msk.bf16.mxu1 %vm495_vm0, %v1227_v12  ;;  %1141 = vmatprep.mubr.msk.bf16.mxu0 %vm495_vm0, %v1228_v13  ;;  %v1538_v12 = vld [vmem:[%s435_s21] sm:$0xff]  ;;  %s1273_s23 = scalar_lea.vmem %s1272_s19, 512  ;;  %p1274_p5 = scmp.lt.s32.totalorder %s1569_s13, %s1272_s19 }
  0x49   : > { %1213 = vset.pattern.permute.xlu1 %v1341_v10  ;;  %1212 = vset.pattern.permute.xlu0 %v1341_v10  ;;  %vm763_vm2 = vcmp.gt.s32.totalorder %v1538_v12, 1  ;;  %vm757_vm3 = vcmp.gt.s32.totalorder %v1538_v12, 0  ;;  %vm771_vm6 = vcmp.gt.s32.totalorder %v1538_v12, 2  ;;  %vm779_vm8 = vcmp.gt.s32.totalorder %v1538_v12, 3  ;;  %p1275_p6 = scmp.lt.s32.totalorder %s1273_s23, %s1267_s16 }
  0x4b   : > { %p1276_p7 = por %p1275_p6, %p1274_p5 }
  0x4d   : > { %p1277_p8 = pnand %p1276_p7, %p1270_p4 }
  0x4f   : > { %1130 = vmatmul.mubr.msk.bf16.gmra.mrb[4].mxu1 %vm495_vm0, %v1229_v14  ;;  %1142 = vmatmul.mubr.msk.bf16.gmra.mrb[4].mxu0 %vm495_vm0, %v1230_v15  ;;  %v1540_v14 = vld [vmem:[%s435_s21 + $0x8] sm:$0xff]  ;;  %v746_v15 = vstv %s745_s12 }
  0x50   : > { %vm764_vm4 = vcmp.gt.s32.totalorder %v1540_v14, 1  ;;  %vm758_vm5 = vcmp.gt.s32.totalorder %v1540_v14, 0  ;;  %vm772_vm7 = vcmp.gt.s32.totalorder %v1540_v14, 2  ;;  %vm780_vm9 = vcmp.gt.s32.totalorder %v1540_v14, 3 }
 0x11a   : > { %v1127_v16 = vpop.f32.mrb[0].mxu1  ;;  %v1139_v17 = vpop.f32.mrb[0].mxu0 }
 0x11b   : > { %v542_v19 = vpop.f32.mrb[1].mxu1  ;;  %v660_v20 = vadd.f32 %v1139_v17, %v1127_v16  ;;  %v651_v21 = vpop.f32.mrb[1].mxu0 }
 0x11c   : > { %v1128_v22 = vpop.f32.mrb[2].mxu1  ;;  %v652_v23 = vadd.f32 %v651_v21, %v542_v19  ;;  %v1140_v24 = vpop.f32.mrb[2].mxu0 }
 0x11d   : > { %v545_v25 = vpop.f32.mrb[3].mxu1  ;;  %v691_v26 = vadd.f32 %v1072_v18, %v660_v20  ;;  %v663_v27 = vadd.f32 %v1140_v24, %v1128_v22  ;;  %v654_v28 = vpop.f32.mrb[3].mxu0  ;;  %v1342_v20 = vmov -1e+30  }
 0x11e   : > { %v689_v29 = vadd.f32 %v1072_v18, %v652_v23  ;;  %v655_v30 = vadd.f32 %v654_v28, %v545_v25  ;;  %v765_v21 = vsel %vm763_vm2, 0.0, %v1342_v20  ;;  %v759_v22 = vsel %vm757_vm3, 0.0, %v1342_v20 }
 0x11f   : > { %1231 = vtanh.f32 %v691_v26  ;;  %v692_v31 = vadd.f32 %v1072_v18, %v663_v27  ;;  %v766_v23 = vsel %vm764_vm4, 0.0, %v1342_v20  ;;  %v760_v24 = vsel %vm758_vm5, 0.0, %v1342_v20 }
 0x120   : > { %1233 = vtanh.f32 %v689_v29  ;;  %v690_v32 = vadd.f32 %v1072_v18, %v655_v30  ;;  %v773_v27 = vsel %vm771_vm6, 0.0, %v1342_v20 }
 0x121   : > { %1235 = vtanh.f32 %v692_v31 }
 0x122   : > { %v1131_v33 = vpop.f32.mrb[4].mxu1  ;;  %1237 = vtanh.f32 %v690_v32  ;;  %v1143_v34 = vpop.f32.mrb[4].mxu0 }
 0x123   : > { %v558_v35 = vpop.f32.mrb[5].mxu1  ;;  %v676_v36 = vadd.f32 %v1143_v34, %v1131_v33  ;;  %v667_v37 = vpop.f32.mrb[5].mxu0  ;;  %v774_v34 = vsel %vm772_vm7, 0.0, %v1342_v20 }
 0x124   : > { %v1132_v38 = vpop.f32.mrb[6].mxu1  ;;  %v668_v39 = vadd.f32 %v667_v37, %v558_v35  ;;  %v1144_v40 = vpop.f32.mrb[6].mxu0 }
 0x125   : > { %v561_v41 = vpop.f32.mrb[7].mxu1  ;;  %v695_v42 = vadd.f32 %v1072_v18, %v676_v36  ;;  %v679_v43 = vadd.f32 %v1144_v40, %v1132_v38  ;;  %v670_v44 = vpop.f32.mrb[7].mxu0  ;;  %v781_v38 = vsel %vm779_vm8, 0.0, %v1342_v20 }
 0x126   : > { %v693_v45 = vadd.f32 %v1072_v18, %v668_v39  ;;  %v671_v46 = vadd.f32 %v670_v44, %v561_v41 }
 0x127   : > { %1239 = vtanh.f32 %v695_v42  ;;  %v696_v47 = vadd.f32 %v1072_v18, %v679_v43  ;;  %v782_v43 = vsel %vm780_vm9, 0.0, %v1342_v20 }
 0x128   : > { %1241 = vtanh.f32 %v693_v45  ;;  %v694_v49 = vadd.f32 %v1072_v18, %v671_v46 }
 0x129   : > { %v1232_v50 = vpop.eup %1231  ;;  %1243 = vtanh.f32 %v696_v47 }
 0x12a   : > { %v1234_v51 = vpop.eup %1233  ;;  %1245 = vtanh.f32 %v694_v49  ;;  %v714_v52 = vmul.f32 %v1232_v50, %v1073_v48 }
 0x12b   : > { %v1236_v53 = vpop.eup %1235  ;;  %v712_v54 = vmul.f32 %v1234_v51, %v1073_v48 }
 0x12c   : > { %v1238_v55 = vpop.eup %1237  ;;  %v727_v56 = vsel %vm720_vm1, %v714_v52, 0.0  ;;  %v715_v57 = vmul.f32 %v1236_v53, %v1073_v48 }
 0x12d   : > { %728 = vadd.xlane.f32.xlu1 %v727_v56  ;;  %v721_v58 = vsel %vm720_vm1, %v712_v54, 0.0  ;;  %v713_v59 = vmul.f32 %v1238_v55, %v1073_v48 }
 0x12e   : > { %722 = vadd.xlane.f32.xlu0 %v721_v58  ;;  %v730_v60 = vsel %vm720_vm1, %v715_v57, 0.0 }
 0x12f   : > { %v724_v62 = vsel %vm720_vm1, %v713_v59, 0.0 }
 0x131   : > { %v1240_v61 = vpop.eup %1239  ;;  %731 = vadd.xlane.f32.xlu1 %v730_v60 }
 0x132   : > { %v1242_v63 = vpop.eup %1241  ;;  %725 = vadd.xlane.f32.xlu0 %v724_v62  ;;  %v718_v5 = vmul.f32 %v1240_v61, %v1073_v48 }
 0x133   : > { %v1244_v0 = vpop.eup %1243  ;;  %v716_v1 = vmul.f32 %v1242_v63, %v1073_v48 }
 0x134   : > { %v1246_v2 = vpop.eup %1245  ;;  %v719_v7 = vmul.f32 %v1244_v0, %v1073_v48  ;;  %v739_v8 = vsel %vm720_vm1, %v718_v5, 0.0 }
 0x135   : > { %v733_v3 = vsel %vm720_vm1, %v716_v1, 0.0  ;;  %v717_v4 = vmul.f32 %v1246_v2, %v1073_v48 }
 0x136   : > { %734 = vadd.xlane.f32.xlu0 %v733_v3  ;;  %v742_v9 = vsel %vm720_vm1, %v719_v7, 0.0 }
 0x137   : > { %v736_v6 = vsel %vm720_vm1, %v717_v4, 0.0 }
 0x138   : > { %737 = vadd.xlane.f32.xlu1 %v736_v6 }
 0x13a   : > { %740 = vadd.xlane.f32.xlu0 %v739_v8 }
 0x13c   : > { %743 = vadd.xlane.f32.xlu1 %v742_v9 }
 0x1ba   : > { %v729_v11 = vpop.xlane.xlu1 %728 }
 0x1bb   : > { %v723_v13 = vpop.xlane.xlu0 %722  ;;  %v749_v17 = vadd.f32 %v746_v15, %v729_v11 }
 0x1bc   : > { %v747_v18 = vadd.f32 %v746_v15, %v723_v13 }
 0x1bd   : > { %v767_v29 = vadd.f32 %v765_v21, %v749_v17 }
 0x1be   : > { %v732_v19 = vpop.xlane.xlu1 %731  ;;  %v761_v30 = vadd.f32 %v759_v22, %v747_v18 }
 0x1bf   : > { %v726_v16 = vpop.xlane.xlu0 %725  ;;  %v750_v25 = vadd.f32 %v746_v15, %v732_v19 }
 0x1c0   : > { %v748_v26 = vadd.f32 %v746_v15, %v726_v16  ;;  %v769_v40 = vmax.f32 %v761_v30, %v767_v29 }
 0x1c1   : > { %v768_v36 = vadd.f32 %v766_v23, %v750_v25 }
 0x1c2   : > { %v762_v37 = vadd.f32 %v760_v24, %v748_v26 }
 0x1c3   : > { %v735_v28 = vpop.xlane.xlu0 %734 }
 0x1c4   : > { %v751_v31 = vadd.f32 %v746_v15, %v735_v28  ;;  %v770_v48 = vmax.f32 %v762_v37, %v768_v36 }
 0x1c5   : > { %v738_v32 = vpop.xlane.xlu1 %737 }
 0x1c6   : > { %v775_v33 = vadd.f32 %v773_v27, %v751_v31  ;;  %v752_v35 = vadd.f32 %v746_v15, %v738_v32 }
 0x1c7   : > { %v741_v39 = vpop.xlane.xlu0 %740 }
 0x1c8   : > { %v753_v41 = vadd.f32 %v746_v15, %v741_v39  ;;  %v776_v42 = vadd.f32 %v774_v34, %v752_v35  ;;  %v777_v45 = vmax.f32 %v769_v40, %v775_v33  ;;  %v1106_v39 = vld [vmem:[%s1486_s20 + $0x8] sm:$0xff]   ;;  %v1091_v40 = vld [vmem:[%s1486_s20] sm:$0xff]  }
 0x1c9   : > { %v744_v44 = vpop.xlane.xlu1 %743  ;;  %v1092_v12 = vunpack.c.l.bf16 %v1091_v40 }
 0x1ca   : > { %v783_v46 = vadd.f32 %v781_v38, %v753_v41  ;;  %v754_v47 = vadd.f32 %v746_v15, %v744_v44  ;;  %v778_v51 = vmax.f32 %v770_v48, %v776_v42  ;;  %v1107_v41 = vld [vmem:[%s1486_s20 + $0x10] sm:$0xff]   ;;  %v1108_v44 = vld [vmem:[%s1486_s20 + $0x18] sm:$0xff]   ;;  %s1089_s20 = sshll.u32 %s1411_s6, 8  ;;  %s919_s6 = scalar_lea.sflag [#allocation6], %s1480_s17 }
 0x1cb   : > { %v1101_v48 = vunpack.c.h.bf16 %v1107_v41  ;;  %s1567_s9 = scalar_lea.hbm %s1622_s7, %s1089_s20 }
 0x1cc   : > { %v785_v49 = vmax.f32 %v777_v45, %v783_v46  ;;  %v784_v50 = vadd.f32 %v782_v43, %v754_v47  ;;  %v1096_v43 = vunpack.c.l.bf16 %v1106_v39  ;;  %v1097_v45 = vunpack.c.h.bf16 %v1106_v39 }
 0x1cd   : > { %v1093_v47 = vunpack.c.h.bf16 %v1091_v40 }
 0x1ce   : > { %v787_v52 = vsub.f32 %v761_v30, %v785_v49  ;;  %v793_v53 = vsub.f32 %v767_v29, %v785_v49  ;;  %v801_v54 = vsub.f32 %v775_v33, %v785_v49  ;;  %v809_v55 = vsub.f32 %v783_v46, %v785_v49 }
 0x1cf   : > { %v786_v56 = vmax.f32 %v778_v51, %v784_v50  ;;  %v1343_v30 = vmov 0.0   ;;  %v1100_v46 = vunpack.c.l.bf16 %v1107_v41  ;;  %v1104_v49 = vunpack.c.l.bf16 %v1108_v44 }
 0x1d0   : > { %v789_v57 = vmul.f32 1.442695, %v787_v52  ;;  %v795_v58 = vmul.f32 1.442695, %v793_v53  ;;  %v803_v59 = vmul.f32 1.442695, %v801_v54  ;;  %v1105_v54 = vunpack.c.h.bf16 %v1108_v44 }
 0x1d1   : > { %v811_v60 = vmul.f32 1.442695, %v809_v55  ;;  %v788_v61 = vsub.f32 %v762_v37, %v786_v56  ;;  %v794_v62 = vsub.f32 %v768_v36, %v786_v56  ;;  %v802_v1 = vsub.f32 %v776_v42, %v786_v56 }
 0x1d2   : > { %1247 = vpow2.f32 %v789_v57  ;;  %v810_v3 = vsub.f32 %v784_v50, %v786_v56  ;;  %v1080_v31 = vsel %vm757_vm3, 1.0, %v1343_v30  ;;  %v1081_v32 = vsel %vm758_vm5, 1.0, %v1343_v30 }
 0x1d3   : > { %1249 = vpow2.f32 %v795_v58  ;;  %v791_v63 = vmul.f32 1.442695, %v788_v61  ;;  %v797_v0 = vmul.f32 1.442695, %v794_v62  ;;  %v805_v2 = vmul.f32 1.442695, %v802_v1 }
 0x1d4   : > { %1251 = vpow2.f32 %v803_v59  ;;  %v813_v4 = vmul.f32 1.442695, %v810_v3  ;;  %v1214_v34 = vpack.i.bf16 %v1081_v32, %v1080_v31 }
 0x1d5   : > { %1253 = vpow2.f32 %v811_v60 }
 0x1d6   : > { %1255 = vpow2.f32 %v791_v63 }
 0x1d7   : > { %1257 = vpow2.f32 %v797_v0 }
 0x1d8   : > { %1259 = vpow2.f32 %v805_v2 }
 0x1d9   : > { %1261 = vpow2.f32 %v813_v4 }
 0x1dc   : > { %v1248_v5 = vpop.eup %1247 }
 0x1dd   : > { %v1250_v6 = vpop.eup %1249 }
 0x1de   : > { %v1252_v7 = vpop.eup %1251  ;;  %v799_v8 = vadd.f32 %v1250_v6, %v1248_v5 }
 0x1df   : > { %v1254_v9 = vpop.eup %1253 }
 0x1e0   : > { %v1256_v10 = vpop.eup %1255  ;;  %v807_v11 = vadd.f32 %v1252_v7, %v799_v8 }
 0x1e1   : > { %v1258_v13 = vpop.eup %1257 }
 0x1e2   : > { %v815_v15 = vadd.f32 %v1254_v9, %v807_v11  ;;  %v800_v16 = vadd.f32 %v1258_v13, %v1256_v10  ;;  %v1260_v17 = vpop.eup %1259 }
 0x1e3   : > { %v1262_v19 = vpop.eup %1261 }
 0x1e4   : > { %1263 = vrcp.f32 %v815_v15  ;;  %v808_v18 = vadd.f32 %v1260_v17, %v800_v16 }
 0x1e6   : > { %v816_v20 = vadd.f32 %v1262_v19, %v808_v18 }
 0x1e8   : > { %1265 = vrcp.f32 %v816_v20 }
 0x1ee   : > { %v1264_v21 = vpop.eup %1263 }
 0x1ef   : > { %v837_v22 = vmul.f32 %v1264_v21, %v1250_v6  ;;  %v823_v23 = vmul.f32 %v1264_v21, %v1248_v5  ;;  %v858_v24 = vmul.f32 %v1264_v21, %v1252_v7  ;;  %v879_v25 = vmul.f32 %v1264_v21, %v1254_v9 }
 0x1f1   : > { %846 = vperm.xlu1 %1213, %v837_v22   ;;  %827 = vperm.xlu0 %1212, %v823_v23  }
 0x1f2   : > { %v1266_v26 = vpop.eup %1265 }
 0x1f3   : > { %v824_v27 = vmul.f32 %v1266_v26, %v1256_v10  ;;  %v838_v28 = vmul.f32 %v1266_v26, %v1258_v13  ;;  %v859_v29 = vmul.f32 %v1266_v26, %v1260_v17  ;;  %v880_v33 = vmul.f32 %v1266_v26, %v1262_v19 }
 0x1f5   : > { %867 = vperm.xlu1 %1213, %v858_v24  }
 0x1f9   : > { %888 = vperm.xlu1 %1213, %v879_v25  }
 0x1fd   : > { %832 = vperm.xlu1 %1213, %v824_v27  }
 0x201   : > { %851 = vperm.xlu1 %1213, %v838_v28  }
 0x205   : > { %872 = vperm.xlu1 %1213, %v859_v29  }
 0x209   : > { %893 = vperm.xlu1 %1213, %v880_v33  }
 0x20d   : > { %1215 = vperm.xlu1 %1213, %v1214_v34  }
 0x270   : > { %v847_v35 = vpop.permute.xlu1 %846  ;;  %v828_v14 = vpop.permute.xlu0 %827 }
 0x271   : > { %v854_v51 = vmul.f32 %v1096_v43, %v847_v35  ;;  %v835_v52 = vmul.f32 %v1092_v12, %v828_v14 }
 0x273   : > { %v856_v59 = vadd.f32 %v854_v51, %v835_v52 }
 0x274   : > { %v868_v36 = vpop.permute.xlu1 %867 }
 0x275   : > { %v875_v55 = vmul.f32 %v1100_v46, %v868_v36 }
 0x277   : > { %v877_v63 = vadd.f32 %v875_v55, %v856_v59 }
 0x278   : > { %v889_v37 = vpop.permute.xlu1 %888 }
 0x279   : > { %v896_v60 = vmul.f32 %v1104_v49, %v889_v37 }
 0x27b   : > { %v898_v2 = vadd.f32 %v896_v60, %v877_v63 }
 0x27c   : > { %v833_v38 = vpop.permute.xlu1 %832 }
 0x27d   : > { %v836_v56 = vmul.f32 %v1093_v47, %v833_v38 }
 0x280   : > { %v852_v42 = vpop.permute.xlu1 %851 }
 0x281   : > { %v855_v53 = vmul.f32 %v1097_v45, %v852_v42 }
 0x283   : > { %v857_v61 = vadd.f32 %v855_v53, %v836_v56 }
 0x284   : > { %v873_v50 = vpop.permute.xlu1 %872 }
 0x285   : > { %v876_v57 = vmul.f32 %v1101_v48, %v873_v50 }
 0x287   : > { %v878_v0 = vadd.f32 %v876_v57, %v857_v61 }
 0x288   : > { %v894_v58 = vpop.permute.xlu1 %893 }
 0x289   : > { %v897_v62 = vmul.f32 %v1105_v54, %v894_v58 }
 0x28b   : > { %v899_v3 = vadd.f32 %v897_v62, %v878_v0 }
 0x28c   : > { %v1216_v1 = vpop.permute.xlu1 %1215 }
 0x28d   : > { %v1218_v4 = vunpack.i.h.bf16 %v1216_v1  ;;  %v1217_v5 = vunpack.i.l.bf16 %v1216_v1 }
 0x28f   : > { %v915_v6 = vmul.f32 %v1218_v4, %v899_v3  ;;  %v914_v7 = vmul.f32 %v1217_v5, %v898_v2 }
 0x291   : > { %917 = vst.msk [vmem:[%s428_s24 + $0x8] sm:$0xff] %vm495_vm0, %v915_v6  ;;  %916 = vst.msk [vmem:[%s428_s24] sm:$0xff] %vm495_vm0, %v914_v7 }
 0x292   : > { %1280 = shalt.err (!%p1277_p8)
}
 0x293   : > { %s1281_s12 = scalar_lea.hbm %s1567_s9, 256  ;;  %s1285_s21 = scalar_lea.hbm %s1622_s7, 512 }
 0x294   : > { %p1282_p12 = scmp.ne.s32.totalorder %s1567_s9, %s1281_s12  ;;  %p1286_p1 = scmp.lt.u32.totalorder %s1567_s9, %s1622_s7 }
 0x295   : > { %p1287_p2 = scmp.lt.u32.totalorder %s1285_s21, %s1281_s12  ;;  %p1289_p4 = scmp.lt.u32.totalorder %s1281_s12, %s1567_s9 }
 0x296   : > { %p1283_p13 = pnand %p1282_p12, %p1438_p9 }
 0x297   : > { %p1288_p3 = por %p1287_p2, %p1286_p1 }
 0x298   : > { %p1284_p0 = pneg %p1283_p13 }
 0x299   : > { %p1290_p5 = por %p1289_p4, %p1288_p3 }
 0x29b   : > { %p1291_p6 = pnand %p1290_p5, %p1284_p0 }
 0x29d   : > { %1294 = shalt.err (!%p1291_p6)
}
 0x29e   : > { %s1345_s24 = smov 128   ;;  %s1346_s25 = smov 8  }
 0x29f   : > { %1162 = dma.vmem_to_hbm [thread:$0]  (%p1438_p9), %s1569_s13, 256, %s1567_s9, %s919_s6, %s1345_s24, %s1345_s24, %s1346_s25  }
 0x2a0 PF: > { %s947_s30 = sand.u32 1, %s1321_s26   ;;  %p1165_p7 = pnand %p1037_p11, %p1442_p10 }
 0x2a1   : > { %s948_s16 = scalar_lea.sflag [#allocation6], %s947_s30 }
 0x2a2   : > { %1316 = dma.done.wait (!%p1165_p7), %s948_s16, 256  }
 0x2a3   : > { %1318 = vsyncadd (!%p1165_p7), %s948_s16, 4294967040  ;;  %p21_p8 = scmp.ge.s32.totalorder %s1415_s8, 4   ;;  %s1629_s26 = smov %s1325_s27 }
 0x2a4   : > { %s1630_s27 = smov %s1329_s28  ;;  %s1631_s28 = smov %s1427_s11 }
 0x2a5   : > { %s1632_s29 = smov %s1415_s8  ;;  %23 = sbr.rel (!%p21_p8) target bundleno = 8 (0x8), region = 153 }
 0x2ac   :  { %953 = vsyncpa [#allocation5], 1 }
 0x2ad   :  { %955 = vsyncpa [#allocation5 + $0x1], 1 }
 0x2ae   :  { %956 = vsyncpa [#allocation6], 1 }
 0x2af   :  { %958 = vsyncpa [#allocation6 + $0x1], 1 }

</bundles_post_ra>
